<compile_context>
chip_gen: v7x
topology: tpu7x:2x2x1
jax: 0.10.0
libtpu: 0.0.40
codegen_flags: <defaults>
</compile_context>

<pallas_src>
import jax
import jax.numpy as jnp
from jax.experimental import pallas as pl
from jax.experimental.pallas import tpu as pltpu


def _make_gather_add_kernel(G):
    """Kernel for one grid step: add `other` to G gathered S-rows and store them."""

    def kernel(idx_ref, *refs):
        # refs = (x_0, ..., x_{G-1}, other, out)
        #   x_g:   (1, B*N, D)  S-row index[j*G + g], selected by the index_map
        #   other: (B*N, D)     broadcast addend (constant index_map -> resident)
        #   out:   (B*N, K, D)  VMEM-resident output block (written back once)
        del idx_ref  # only consumed by the index_maps (scalar prefetch)
        x_refs = refs[:G]
        other_ref, o_ref = refs[G], refs[G + 1]

        other = other_ref[...]                       # (B*N, D) dense vregs
        j = pl.program_id(0)
        for g in range(G):                           # static unroll
            row = x_refs[g][0] + other               # pure VPU add, (B*N, D)
            o_ref[:, pl.ds(j * G + g, 1), :] = row[:, None, :].astype(o_ref.dtype)

    return kernel


def torch_model_forward(tensor_list, other, index):
    """tensor_list: list of N arrays (B, S, D); other: (1, N, D); index: (K,) ints."""
    N = len(tensor_list)
    B, S, D = tensor_list[0].shape
    BN = B * N
    K = index.shape[0]

    # Clamp so a bad index can't trigger an out-of-range gather DMA.
    index = jnp.clip(index.astype(jnp.int32), 0, S - 1)

    # --- input relayout (single fused copy) -----------------------------------
    # stack(axis=2) already places (N, D) on the minor dims; the transpose only
    # permutes major dims (S <-> B) and the reshape merges (B, N) -> B*N, so XLA
    # can fold the chain into the one concat pass the torch.stack requires.
    x_t = jnp.stack(tensor_list, axis=2)             # (B, S, N, D)
    x_t = jnp.transpose(x_t, (1, 0, 2, 3))           # (S, B, N, D)  major-only permute
    x_t = jnp.reshape(x_t, (S, BN, D))               # (S, B*N, D)   lane/sublane dense

    # Broadcast the addend over B once (tiny); row order matches b*N + n.
    other_b = jnp.broadcast_to(other.reshape(1, N, D), (B, N, D)).reshape(BN, D)

    # Batch G gathered rows per grid step to amortize per-step overhead and keep
    # 2*G row DMAs in flight (each of the G input pipelines is double-buffered).
    G = 4 if K % 4 == 0 else (2 if K % 2 == 0 else 1)
    grid = (K // G,)

    def x_spec(g):
        # Data-dependent gather: pick S-row index[j*G + g] for grid step j.
        return pl.BlockSpec((1, BN, D), lambda j, idx, g=g: (idx[j * G + g], 0, 0))

    in_specs = [x_spec(g) for g in range(G)] + [
        pl.BlockSpec((BN, D), lambda j, idx: (0, 0)),            # addend, resident
    ]
    # Whole output as one resident block: no post-kernel transpose, one HBM write.
    out_specs = pl.BlockSpec((BN, K, D), lambda j, idx: (0, 0, 0))

    # VMEM budget: double-buffered gathered inputs + addend + resident output.
    itemsize = jnp.dtype(x_t.dtype).itemsize
    vmem_bytes = (2 * G * BN * D + 2 * BN * D + BN * K * D) * itemsize
    vmem_limit = min(max(4 * vmem_bytes, 8 * 1024 * 1024), 32 * 1024 * 1024)

    out = pl.pallas_call(
        _make_gather_add_kernel(G),
        out_shape=jax.ShapeDtypeStruct((BN, K, D), x_t.dtype),
        grid_spec=pltpu.PrefetchScalarGridSpec(
            num_scalar_prefetch=1,
            grid=grid,
            in_specs=in_specs,
            out_specs=out_specs,
        ),
        compiler_params=pltpu.CompilerParams(
            # Output block is resident across the K axis, so it must stay
            # "arbitrary" (megacore sharding would race on it; op is HBM-bound).
            dimension_semantics=("arbitrary",),
            vmem_limit_bytes=vmem_limit,
        ),
    )(index, *([x_t] * G), other_b)

    # (B*N, K, D) -> (B, N, K, D): splits a major dim only -> free metadata reshape.
    return out.reshape(B, N, K, D)


if __name__ == "__main__":
    # Small shapes consistent with the module:
    #   original: 10 tensors of (B, S, 1024), weight (1, 10, 1024), index len 10
    #   here:     N=4 tensors of (B=2, S=16, D=128), other (1, 4, 128), index len 8
    B, N, S, D, K = 2, 4, 16, 128, 8

    key = jax.random.PRNGKey(0)
    keys = jax.random.split(key, N + 1)
    tensor_list = [
        jax.random.normal(keys[i], (B, S, D), dtype=jnp.float32) for i in range(N)
    ]
    other = jax.random.normal(keys[N], (1, N, D), dtype=jnp.float32)
    index = jnp.arange(1, 1 + K, dtype=jnp.int32)    # analogous to [1..10], all < S

    result = jax.block_until_ready(torch_model_forward(tensor_list, other, index))

    # Pure-JAX reference (same semantics as the PyTorch module)
    x_ref = jnp.stack(tensor_list, axis=1)           # (B, N, S, D)
    ref = x_ref + other[:, :, None, :]               # + other.unsqueeze(2)
    ref = ref[:, :, index, :]                        # gather along S

    assert result.shape == (B, N, K, D), result.shape
    assert jnp.allclose(result, ref, atol=1e-6, rtol=1e-6)

    print("KERNEL_OK")
</pallas_src>

<mosaic_0001>
module attributes {stable_mosaic.version = 11 : i64} {
  func.func @kernel(%arg0: i32, %arg1: memref<8xi32, #tpu.memory_space<smem>>, %arg2: memref<1x8x128xf32, #tpu.memory_space<vmem>>, %arg3: memref<1x8x128xf32, #tpu.memory_space<vmem>>, %arg4: memref<1x8x128xf32, #tpu.memory_space<vmem>>, %arg5: memref<1x8x128xf32, #tpu.memory_space<vmem>>, %arg6: memref<8x128xf32, #tpu.memory_space<vmem>>, %arg7: memref<8x8x128xf32, #tpu.memory_space<vmem>>) attributes {dimension_semantics = [#tpu.dimension_semantics<arbitrary>], iteration_bounds = array<i64: 2>, scalar_prefetch = 1 : i64, scratch_operands = 0 : i64, tpu.core_type = #tpu.core_type<tc>, window_params = [{transform_indices = @transform_0, window_bounds = array<i64: 1, 8, 128>}, {transform_indices = @transform_1, window_bounds = array<i64: 1, 8, 128>}, {transform_indices = @transform_2, window_bounds = array<i64: 1, 8, 128>}, {transform_indices = @transform_3, window_bounds = array<i64: 1, 8, 128>}, {pipeline_mode = #tpu.pipeline_mode<synchronous>, transform_indices = @transform_4, window_bounds = array<i64: 8, 128>}, {pipeline_mode = #tpu.pipeline_mode<synchronous>, transform_indices = @transform_5, window_bounds = array<i64: 8, 8, 128>}]} {
    %c0 = arith.constant 0 : index
    %c0_0 = arith.constant 0 : index
    %0 = vector.load %arg6[%c0, %c0_0] : memref<8x128xf32, #tpu.memory_space<vmem>>, vector<8x128xf32>
    %c0_1 = arith.constant 0 : index
    %c0_2 = arith.constant 0 : index
    %c0_3 = arith.constant 0 : index
    %1 = vector.load %arg2[%c0_1, %c0_2, %c0_3] : memref<1x8x128xf32, #tpu.memory_space<vmem>>, vector<1x8x128xf32>
    %2 = vector.shape_cast %1 : vector<1x8x128xf32> to vector<8x128xf32>
    %3 = arith.addf %2, %0 : vector<8x128xf32>
    %4 = vector.shape_cast %3 : vector<8x128xf32> to vector<8x1x128xf32>
    %c4_i32 = arith.constant 4 : i32
    %5 = arith.muli %arg0, %c4_i32 : i32
    %c0_i32 = arith.constant 0 : i32
    %6 = arith.addi %5, %c0_i32 : i32
    %c0_4 = arith.constant 0 : index
    %7 = arith.index_cast %6 : i32 to index
    %c0_5 = arith.constant 0 : index
    %8 = vector.load %arg7[%c0_4, %7, %c0_5] : memref<8x8x128xf32, #tpu.memory_space<vmem>>, vector<8x1x128xf32>
    tpu.vector_store %arg7[%c0_4, %7, %c0_5], %4 {strides = array<i32>} : memref<8x8x128xf32, #tpu.memory_space<vmem>>, vector<8x1x128xf32>,
    %c0_6 = arith.constant 0 : index
    %c0_7 = arith.constant 0 : index
    %c0_8 = arith.constant 0 : index
    %9 = vector.load %arg3[%c0_6, %c0_7, %c0_8] : memref<1x8x128xf32, #tpu.memory_space<vmem>>, vector<1x8x128xf32>
    %10 = vector.shape_cast %9 : vector<1x8x128xf32> to vector<8x128xf32>
    %11 = arith.addf %10, %0 : vector<8x128xf32>
    %12 = vector.shape_cast %11 : vector<8x128xf32> to vector<8x1x128xf32>
    %c4_i32_9 = arith.constant 4 : i32
    %13 = arith.muli %arg0, %c4_i32_9 : i32
    %c1_i32 = arith.constant 1 : i32
    %14 = arith.addi %13, %c1_i32 : i32
    %c0_10 = arith.constant 0 : index
    %15 = arith.index_cast %14 : i32 to index
    %c0_11 = arith.constant 0 : index
    %16 = vector.load %arg7[%c0_10, %15, %c0_11] : memref<8x8x128xf32, #tpu.memory_space<vmem>>, vector<8x1x128xf32>
    tpu.vector_store %arg7[%c0_10, %15, %c0_11], %12 {strides = array<i32>} : memref<8x8x128xf32, #tpu.memory_space<vmem>>, vector<8x1x128xf32>,
    %c0_12 = arith.constant 0 : index
    %c0_13 = arith.constant 0 : index
    %c0_14 = arith.constant 0 : index
    %17 = vector.load %arg4[%c0_12, %c0_13, %c0_14] : memref<1x8x128xf32, #tpu.memory_space<vmem>>, vector<1x8x128xf32>
    %18 = vector.shape_cast %17 : vector<1x8x128xf32> to vector<8x128xf32>
    %19 = arith.addf %18, %0 : vector<8x128xf32>
    %20 = vector.shape_cast %19 : vector<8x128xf32> to vector<8x1x128xf32>
    %c4_i32_15 = arith.constant 4 : i32
    %21 = arith.muli %arg0, %c4_i32_15 : i32
    %c2_i32 = arith.constant 2 : i32
    %22 = arith.addi %21, %c2_i32 : i32
    %c0_16 = arith.constant 0 : index
    %23 = arith.index_cast %22 : i32 to index
    %c0_17 = arith.constant 0 : index
    %24 = vector.load %arg7[%c0_16, %23, %c0_17] : memref<8x8x128xf32, #tpu.memory_space<vmem>>, vector<8x1x128xf32>
    tpu.vector_store %arg7[%c0_16, %23, %c0_17], %20 {strides = array<i32>} : memref<8x8x128xf32, #tpu.memory_space<vmem>>, vector<8x1x128xf32>,
    %c0_18 = arith.constant 0 : index
    %c0_19 = arith.constant 0 : index
    %c0_20 = arith.constant 0 : index
    %25 = vector.load %arg5[%c0_18, %c0_19, %c0_20] : memref<1x8x128xf32, #tpu.memory_space<vmem>>, vector<1x8x128xf32>
    %26 = vector.shape_cast %25 : vector<1x8x128xf32> to vector<8x128xf32>
    %27 = arith.addf %26, %0 : vector<8x128xf32>
    %28 = vector.shape_cast %27 : vector<8x128xf32> to vector<8x1x128xf32>
    %c4_i32_21 = arith.constant 4 : i32
    %29 = arith.muli %arg0, %c4_i32_21 : i32
    %c3_i32 = arith.constant 3 : i32
    %30 = arith.addi %29, %c3_i32 : i32
    %c0_22 = arith.constant 0 : index
    %31 = arith.index_cast %30 : i32 to index
    %c0_23 = arith.constant 0 : index
    %32 = vector.load %arg7[%c0_22, %31, %c0_23] : memref<8x8x128xf32, #tpu.memory_space<vmem>>, vector<8x1x128xf32>
    tpu.vector_store %arg7[%c0_22, %31, %c0_23], %28 {strides = array<i32>} : memref<8x8x128xf32, #tpu.memory_space<vmem>>, vector<8x1x128xf32>,
    return
  }
  func.func @transform_0(%arg0: i32, %arg1: memref<8xi32, #tpu.memory_space<smem>>) -> (i32, i32, i32) {
    %c4_i32 = arith.constant 4 : i32
    %0 = arith.muli %arg0, %c4_i32 : i32
    %c0_i32 = arith.constant 0 : i32
    %1 = arith.addi %0, %c0_i32 : i32
    %2 = arith.index_cast %1 : i32 to index
    %3 = memref.load %arg1[%2] : memref<8xi32, #tpu.memory_space<smem>>
    %c0_i32_0 = arith.constant 0 : i32
    %c0_i32_1 = arith.constant 0 : i32
    %c0_i32_2 = arith.constant 0 : i32
    return %3, %c0_i32_0, %c0_i32_1 : i32, i32, i32
  }
  func.func @transform_1(%arg0: i32, %arg1: memref<8xi32, #tpu.memory_space<smem>>) -> (i32, i32, i32) {
    %c4_i32 = arith.constant 4 : i32
    %0 = arith.muli %arg0, %c4_i32 : i32
    %c1_i32 = arith.constant 1 : i32
    %1 = arith.addi %0, %c1_i32 : i32
    %2 = arith.index_cast %1 : i32 to index
    %3 = memref.load %arg1[%2] : memref<8xi32, #tpu.memory_space<smem>>
    %c0_i32 = arith.constant 0 : i32
    %c0_i32_0 = arith.constant 0 : i32
    %c0_i32_1 = arith.constant 0 : i32
    return %3, %c0_i32, %c0_i32_0 : i32, i32, i32
  }
  func.func @transform_2(%arg0: i32, %arg1: memref<8xi32, #tpu.memory_space<smem>>) -> (i32, i32, i32) {
    %c4_i32 = arith.constant 4 : i32
    %0 = arith.muli %arg0, %c4_i32 : i32
    %c2_i32 = arith.constant 2 : i32
    %1 = arith.addi %0, %c2_i32 : i32
    %2 = arith.index_cast %1 : i32 to index
    %3 = memref.load %arg1[%2] : memref<8xi32, #tpu.memory_space<smem>>
    %c0_i32 = arith.constant 0 : i32
    %c0_i32_0 = arith.constant 0 : i32
    %c0_i32_1 = arith.constant 0 : i32
    return %3, %c0_i32, %c0_i32_0 : i32, i32, i32
  }
  func.func @transform_3(%arg0: i32, %arg1: memref<8xi32, #tpu.memory_space<smem>>) -> (i32, i32, i32) {
    %c4_i32 = arith.constant 4 : i32
    %0 = arith.muli %arg0, %c4_i32 : i32
    %c3_i32 = arith.constant 3 : i32
    %1 = arith.addi %0, %c3_i32 : i32
    %2 = arith.index_cast %1 : i32 to index
    %3 = memref.load %arg1[%2] : memref<8xi32, #tpu.memory_space<smem>>
    %c0_i32 = arith.constant 0 : i32
    %c0_i32_0 = arith.constant 0 : i32
    %c0_i32_1 = arith.constant 0 : i32
    return %3, %c0_i32, %c0_i32_0 : i32, i32, i32
  }
  func.func @transform_4(%arg0: i32, %arg1: memref<8xi32, #tpu.memory_space<smem>>) -> (i32, i32) {
    %c0_i32 = arith.constant 0 : i32
    %c0_i32_0 = arith.constant 0 : i32
    %c0_i32_1 = arith.constant 0 : i32
    return %c0_i32, %c0_i32_0 : i32, i32
  }
  func.func @transform_5(%arg0: i32, %arg1: memref<8xi32, #tpu.memory_space<smem>>) -> (i32, i32, i32) {
    %c0_i32 = arith.constant 0 : i32
    %c0_i32_0 = arith.constant 0 : i32
    %c0_i32_1 = arith.constant 0 : i32
    %c0_i32_2 = arith.constant 0 : i32
    return %c0_i32, %c0_i32_0, %c0_i32_1 : i32, i32, i32
  }
}

</mosaic_0001>

<bundles_post_ra>
// kernel: tpu_custom_call.1
= control target key start
LH: loop header
LB: loop body
LE: loop exit
PB: predicated region body
PF: predicated region fallthrough
CT: control target
= control target key end

     0   :  { %s1920_s0 = inlined_call_operand.hbm [shape: s32[8], index: 0, kind: input, shape index: {}]   ;;  %s1921_s1 = inlined_call_operand.hbm [shape: f32[16,8,128], index: 1, kind: input, shape index: {}]   ;;  %s1922_s2 = inlined_call_operand.hbm [shape: f32[16,8,128], index: 2, kind: input, shape index: {}]   ;;  %s1923_s3 = inlined_call_operand.hbm [shape: f32[16,8,128], index: 3, kind: input, shape index: {}]   ;;  %s1924_s4 = inlined_call_operand.hbm [shape: f32[16,8,128], index: 4, kind: input, shape index: {}]   ;;  %s1925_s5 = inlined_call_operand.vmem [shape: f32[8,128], index: 5, kind: input, shape index: {}]   ;;  %s1926_s6 = inlined_call_operand.hbm [shape: f32[8,8,128], index: 6, kind: output, shape index: {}]  }
   0x1   :  { %1943 = sst [smem:[#allocation34_spill]] %s1922_s2  ;;  %s1039_s23 = scalar_lea.hbm %s1920_s0, 16 }
   0x2   :  { %1944 = sst [smem:[#allocation35_spill]] %s1924_s4  ;;  %p1040_p0 = scmp.ne.s32.totalorder %s1920_s0, %s1039_s23 }
   0x3   :  { %1945 = sst [smem:[#allocation36_spill]] %s1925_s5  ;;  %p1043_p1 = scmp.lt.u32.totalorder %s1039_s23, %s1920_s0 }
   0x4   :  { %1946 = sst [smem:[#allocation37_spill]] %s1926_s6 }
   0x5   :  { %p1045_p2 = pnand %p1043_p1, %p1040_p0 }
   0x7   :  { %1048 = shalt.err (!%p1045_p2)  }
   0x8   :  { %s1321_s28 = smov [#allocation3]  }
   0x9   :  { %12 = dma.hbm_to_smem %s1920_s0, 16, %s1321_s28, [#allocation2] }
   0xa   :  { %1247 = dma.done.wait [#allocation2], 16 }
   0xb   :  { %1248 = vsyncadd [#allocation2], 4294967280 }
   0xc   :  { %14 = sfence }
   0xd   :  { %15 = vsyncpa [#allocation5], 0 }
   0xe   :  { %17 = vsyncpa [#allocation5 + $0x1], 0 }
   0xf   :  { %18 = vsyncpa [#allocation8], 0 }
  0x10   :  { %20 = vsyncpa [#allocation8 + $0x1], 0 }
  0x11   :  { %21 = vsyncpa [#allocation11], 0 }
  0x12   :  { %23 = vsyncpa [#allocation11 + $0x1], 0 }
  0x13   :  { %24 = vsyncpa [#allocation6], 0  ;;  %s1377_s7 = smov 0   ;;  %s1379_s8 = smov 0  }
  0x14   :  { %s1381_s9 = smov 0   ;;  %s1383_s10 = smov 0  }
  0x15   :  { %s1385_s11 = smov 0   ;;  %s1387_s0 = smov 0  }
  0x16   :  { %s1389_s12 = smov 0   ;;  %s1391_s13 = smov 0  }
  0x17   :  { %s1393_s14 = smov 0   ;;  %s1395_s15 = smov 0  }
  0x18   :  { %s1397_s16 = smov 0   ;;  %s1399_s17 = smov 0  }
  0x19   :  { %s1401_s18 = smov 0  }
  0x1a LB: > { %1947 = sst [smem:[#allocation27_spill]] %s1299_s13  ;;  %s1441_s19 = sadd.s32 4294967295, %s1319_s18   ;;  %s1319_s18 = sphi %s1401_s18, %s30_s18   ;;  %s1315_s17 = sphi %s1399_s17, %s2001_s17   ;;  %s1311_s16 = sphi %s1397_s16, %s2010_s16   ;;  %s1307_s15 = sphi %s1395_s15, %s2009_s15   ;;  %s1303_s14 = sphi %s1393_s14, %s1999_s14   ;;  %s1299_s13 = sphi %s1391_s13, %s2008_s13   ;;  %s1295_s12 = sphi %s1389_s12, %s1997_s12   ;;  %s1291_s0 = sphi %s1387_s0, %s2007_s0   ;;  %s1287_s11 = sphi %s1385_s11, %s2006_s11   ;;  %s1283_s10 = sphi %s1383_s10, %s2005_s10   ;;  %s1279_s9 = sphi %s1381_s9, %s2004_s9   ;;  %s1275_s8 = sphi %s1379_s8, %s2003_s8   ;;  %s1271_s7 = sphi %s1377_s7, %s2002_s7  }
  0x1b   : > { %1948 = sst [smem:[#allocation28_spill]] %s1303_s14  ;;  %s1444_s20 = sshll.u32 %s1319_s18, 2 }
  0x1c   : > { %1949 = sst [smem:[#allocation29_spill]] %s1315_s17  ;;  %s1447_s21 = sadd.s32 4, %s1444_s20 }
  0x1d   : > { %p1932_p3 = scmp.eq.s32.totalorder %s1319_s18, 0  ;;  %p1933_p4 = scmp.eq.s32.totalorder %s1441_s19, 0 }
  0x1e   : > { %s65_s22 = sadd.s32 1, %s1444_s20  ;;  %s68_s24 = sadd.s32 1, %s1447_s21 }
  0x1f   : > { %s66_s23 = sld [smem:[#allocation3 + %s65_s22]]  ;;  %s73_s26 = sadd.s32 1, %s1303_s14 }
  0x20   : > { %s69_s25 = sld [smem:[#allocation3 + %s68_s24]]  ;;  %p80_p5 = scmp.ne.s32.totalorder %s1303_s14, %s1299_s13 }
  0x21   : > { %p86_p6 = scmp.ne.s32.totalorder %s1299_s13, %s1295_s12  ;;  %p1931_p7 = scmp.lt.s32.totalorder %s1319_s18, 2 }
  0x22   : > { %p1460_p8 = por %p80_p5, %p1932_p3  ;;  %s239_s29 = sand.u32 1, %s1319_s18  }
  0x23   : > { %p1466_p9 = por %p86_p6, %p1933_p4  ;;  %s241_s30 = sand.u32 1, %s1303_s14  }
  0x24   : > { %s816_s12 = sshll.u32 %s241_s30, 3  ;;  %s2012_s22 = smov (!%p1460_p8, %s65_s22), 0 }
  0x25   : > { %s1951_s28 = scalar_select %p1466_p9, 1, 0 }
  0x26   : > { %s70_s24 = ssub.s32 %s66_s23, %s69_s25  ;;  %s243_s6 = scalar_lea.vmem [#allocation7], %s816_s12 }
  0x27   : > { %1952 = sst [smem:[#allocation30_spill]] %s1951_s28  ;;  %p71_p10 = scmp.eq.s32.totalorder %s70_s24, 0 }
  0x28   : > { %s253_s5 = sshll.u32 %s243_s6, 4  ;;  %s2016_s22 = smov (!%p1931_p7, %s2012_s22), 0  ;;  %s1483_s5 = int_to_ptr.vmem [resolvable:$true] %s253_s5 }
  0x29   : > { %s889_s13 = scalar_select %p1460_p8, [#allocation3], [#allocation14] }
  0x2a   : > { %s1475_s4 = scalar_select %p71_p10, %s1303_s14, %s73_s26  }
  0x2b   : > { %s2014_s13 = smov (!%p1931_p7, %s889_s13), [#allocation18]  ;;  %p1489_p11 = pnand %p1931_p7, %p1460_p8 }
  0x2c   : > { %1953 = sst [smem:[#allocation31_spill]] %s1475_s4  ;;  %p825_p12 = scmp.ge.s32.totalorder %s1319_s18, 1 }
  0x2d   : > { %s246_s6 = sld [smem:[%s2014_s13 + %s2016_s22]]  ;;  %p300_p13 = scmp.lt.s32.totalorder %s1319_s18, 3 }
  0x2e   : > { %s1500_s26 = sld [smem:[#allocation3 + %s1444_s20]]  ;;  %s1510_s13 = scalar_lea.sflag [#allocation8], %s239_s29 }
  0x2f   : > { %p1495_p0 = pnand %p825_p12, %p300_p13  ;;  %s1503_s12 = sld [smem:[#allocation3 + %s1447_s21]] }
  0x30   : > { %s1956_s2 = sld [smem:[#allocation34_spill]]  ;;  %p1051_p2 = pneg %p1489_p11 }
  0x33   : > { %s818_s30 = sshll.u32 %s246_s6, 7 }
  0x36   : > { %s1508_s4 = scalar_lea.hbm %s1956_s2, %s818_s30  ;;  %s1054_s27 = scalar_lea.hbm %s1956_s2, 2048 }
  0x37   : > { %s1049_s22 = scalar_lea.hbm %s1508_s4, 128  ;;  %p1055_p8 = scmp.lt.u32.totalorder %s1508_s4, %s1956_s2 }
  0x38   : > { %p1050_p1 = scmp.ne.s32.totalorder %s1508_s4, %s1049_s22  ;;  %p1056_p10 = scmp.lt.u32.totalorder %s1054_s27, %s1049_s22 }
  0x39   : > { %p1058_p13 = scmp.lt.u32.totalorder %s1049_s22, %s1508_s4 }
  0x3a   : > { %p1052_p5 = pnand %p1051_p2, %p1050_p1  ;;  %p1057_p12 = por %p1056_p10, %p1055_p8 }
  0x3c   : > { %p1053_p6 = pneg %p1052_p5  ;;  %p1059_p7 = por %p1058_p13, %p1057_p12 }
  0x3e   : > { %p1060_p3 = pnand %p1059_p7, %p1053_p6 }
  0x40   : > { %1063 = shalt.err (!%p1060_p3)
}
  0x41   : > { %s1064_s29 = scalar_lea.vmem %s1483_s5, 128  ;;  %s1322_s14 = smov [#allocation7]  }
  0x42   : > { %p1065_p1 = scmp.ne.s32.totalorder %s1483_s5, %s1064_s29  ;;  %s1069_s6 = sshll.u32 %s1322_s14, 4  ;;  %s1070_s6 = int_to_ptr.vmem [resolvable:$false] %s1069_s6 }
  0x43   : > { %s1071_s30 = scalar_lea.vmem %s1070_s6, 256  ;;  %p1072_p9 = scmp.lt.s32.totalorder %s1483_s5, %s1070_s6 }
  0x44   : > { %p1067_p5 = pnand %p1065_p1, %p1051_p2  ;;  %p1073_p8 = scmp.lt.s32.totalorder %s1071_s30, %s1064_s29 }
  0x46   : > { %p1068_p4 = pneg %p1067_p5  ;;  %p1074_p10 = por %p1073_p8, %p1072_p9 }
  0x48   : > { %p1075_p12 = pnand %p1074_p10, %p1068_p4 }
  0x4a   : > { %1078 = shalt.err (!%p1075_p12)
}
  0x4b   : > { %916 = dma.hbm_to_vmem [thread:$0]  (!%p1489_p11), %s1508_s4, 128, %s1483_s5, %s1510_s13  }
  0x4c   : > { %p48_p3 = scmp.ne.s32.totalorder %s1315_s17, %s1311_s16  ;;  %p54_p4 = scmp.ne.s32.totalorder %s1311_s16, %s1307_s15 }
  0x4d   : > { %s41_s23 = sadd.s32 1, %s1315_s17  ;;  %s219_s22 = sand.u32 1, %s1315_s17  }
  0x4e   : > { %p1957_p7 = scmp.eq.s32.totalorder %s1441_s19, 0  ;;  %s38_s24 = ssub.s32 %s1500_s26, %s1503_s12 }
  0x4f   : > { %p1960_p2 = scmp.eq.s32.totalorder %s1319_s18, 0  ;;  %p39_p13 = scmp.eq.s32.totalorder %s38_s24, 0 }
  0x50   : > { %p1546_p9 = por %p1957_p7, %p54_p4  ;;  %s813_s29 = sshll.u32 %s219_s22, 3 }
  0x51   : > { %p50_p6 = por %p1960_p2, %p48_p3  ;;  %p1961_p1 = scmp.lt.s32.totalorder %s1319_s18, 2 }
  0x52   : > { %s1958_s27 = scalar_select %p1546_p9, 1, 0 }
  0x53   : > { %p1556_p11 = pnand %p1961_p1, %p50_p6  ;;  %p1964_p5 = pmov %p1961_p1 }
  0x54   : > { %1959 = sst [smem:[#allocation32_spill]] %s1958_s27  ;;  %p1965_p8 = pmov %p1961_p1 }
  0x55   : > { %s1561_s5 = scalar_select %p39_p13, %s1315_s17, %s41_s23  }
  0x56   : > { %s886_s15 = scalar_select %p50_p6, [#allocation3], [#allocation13] }
  0x57   : > { %1963 = sst [smem:[#allocation33_spill]] %s1561_s5  ;;  %s223_s12 = scalar_lea.vmem [#allocation4], %s813_s29 }
  0x58   : > { %s887_s14 = scalar_select %p50_p6, %s1444_s20, 0 }
  0x59   : > { %s2018_s15 = smov (!%p1964_p5, %s886_s15), [#allocation17]  ;;  %s232_s6 = sshll.u32 %s223_s12, 4  ;;  %s1574_s6 = int_to_ptr.vmem [resolvable:$true] %s232_s6 }
  0x5a   : > { %s2020_s14 = smov (!%p1965_p8, %s887_s14), 0  ;;  %s97_s30 = sadd.s32 2, %s1444_s20 }
  0x5b   : > { %s225_s26 = sld [smem:[%s2018_s15 + %s2020_s14]]  ;;  %s100_s2 = sadd.s32 2, %s1447_s21 }
  0x5c   : > { %s1571_s24 = sld [smem:[#allocation3 + %s97_s30]]  ;;  %s220_s29 = scalar_lea.sflag [#allocation5], %s219_s22 }
  0x5d   : > { %s1576_s23 = sld [smem:[#allocation3 + %s100_s2]]  ;;  %p1081_p4 = pneg %p1556_p11 }
  0x5e   : > { %s1084_s17 = scalar_lea.hbm %s1921_s1, 2048 }
  0x61   : > { %s815_s5 = sshll.u32 %s225_s26, 7 }
  0x62   : > { %s1583_s27 = scalar_lea.hbm %s1921_s1, %s815_s5 }
  0x63   : > { %s1079_s15 = scalar_lea.hbm %s1583_s27, 128  ;;  %p1085_p6 = scmp.lt.u32.totalorder %s1583_s27, %s1921_s1 }
  0x64   : > { %p1080_p3 = scmp.ne.s32.totalorder %s1583_s27, %s1079_s15  ;;  %p1086_p13 = scmp.lt.u32.totalorder %s1084_s17, %s1079_s15 }
  0x65   : > { %p1088_p5 = scmp.lt.u32.totalorder %s1079_s15, %s1583_s27 }
  0x66   : > { %p1082_p7 = pnand %p1081_p4, %p1080_p3  ;;  %p1087_p1 = por %p1086_p13, %p1085_p6 }
  0x68   : > { %p1083_p2 = pneg %p1082_p7  ;;  %p1089_p8 = por %p1088_p5, %p1087_p1 }
  0x6a   : > { %p1090_p12 = pnand %p1089_p8, %p1083_p2 }
  0x6c   : > { %1093 = shalt.err (!%p1090_p12)
}
  0x6d   : > { %s1094_s22 = scalar_lea.vmem %s1574_s6, 128  ;;  %s1323_s26 = smov [#allocation4]  }
  0x6e   : > { %p1095_p3 = scmp.ne.s32.totalorder %s1574_s6, %s1094_s22  ;;  %s1099_s12 = sshll.u32 %s1323_s26, 4  ;;  %s1100_s12 = int_to_ptr.vmem [resolvable:$false] %s1099_s12 }
  0x6f   : > { %s1101_s2 = scalar_lea.vmem %s1100_s12, 256  ;;  %p1102_p9 = scmp.lt.s32.totalorder %s1574_s6, %s1100_s12 }
  0x70   : > { %p1097_p7 = pnand %p1095_p3, %p1081_p4  ;;  %p1103_p6 = scmp.lt.s32.totalorder %s1101_s2, %s1094_s22 }
  0x72   : > { %p1098_p10 = pneg %p1097_p7  ;;  %p1104_p13 = por %p1103_p6, %p1102_p9 }
  0x74   : > { %p1105_p1 = pnand %p1104_p13, %p1098_p10 }
  0x76   : > { %1108 = shalt.err (!%p1105_p1)
}
  0x77   : > { %911 = dma.hbm_to_vmem [thread:$0]  (!%p1556_p11), %s1583_s27, 128, %s1574_s6, %s220_s29  }
  0x78   : > { %p1966_p9 = scmp.eq.s32.totalorder %s1319_s18, 0  ;;  %p1967_p10 = scmp.ne.s32.totalorder %s1291_s0, %s1287_s11 }
  0x79   : > { %p1969_p4 = scmp.eq.s32.totalorder %s1441_s19, 0  ;;  %p1970_p2 = scmp.ne.s32.totalorder %s1287_s11, %s1283_s10 }
  0x7a   : > { %p1617_p12 = por %p1967_p10, %p1966_p9  ;;  %s105_s14 = sadd.s32 1, %s1291_s0 }
  0x7b   : > { %p1626_p5 = por %p1970_p2, %p1969_p4  ;;  %s262_s17 = sand.u32 1, %s1291_s0  }
  0x7c   : > { %s102_s27 = ssub.s32 %s1571_s24, %s1576_s23  ;;  %s819_s6 = sshll.u32 %s262_s17, 3 }
  0x7d   : > { %s1971_s15 = scalar_select %p1626_p5, 1, 0 }
  0x7e   : > { %p103_p11 = scmp.eq.s32.totalorder %s102_s27, 0  ;;  %s2022_s30 = smov (!%p1617_p12, %s97_s30), 0 }
  0x7f   : > { %s892_s29 = scalar_select %p1617_p12, [#allocation3], [#allocation15] }
  0x80   : > { %s1637_s10 = scalar_select %p103_p11, %s1291_s0, %s105_s14  }
  0x81   : > { %p1972_p8 = scmp.lt.s32.totalorder %s1319_s18, 2  ;;  %s264_s28 = scalar_lea.vmem [#allocation9], %s819_s6 }
  0x82   : > { %s274_s5 = sshll.u32 %s264_s28, 4  ;;  %s129_s22 = sadd.s32 3, %s1444_s20  ;;  %s1655_s5 = int_to_ptr.vmem [resolvable:$true] %s274_s5 }
  0x83   : > { %s2024_s29 = smov (!%p1972_p8, %s892_s29), [#allocation19]  ;;  %p1973_p3 = pmov %p1972_p8 }
  0x84   : > { %s132_s26 = sadd.s32 3, %s1447_s21  ;;  %s1661_s12 = sld [smem:[#allocation3 + %s129_s22]] }
  0x85   : > { %s2026_s30 = smov (!%p1973_p3, %s2022_s30), 0  ;;  %p1974_p7 = pmov %p1973_p3 }
  0x86   : > { %s267_s23 = sld [smem:[%s2024_s29 + %s2026_s30]]  ;;  %s1114_s29 = scalar_lea.hbm %s1923_s3, 2048 }
  0x87   : > { %p1651_p6 = pnand %p1974_p7, %p1617_p12  ;;  %s1663_s2 = sld [smem:[#allocation3 + %s132_s26]] }
  0x89   : > { %p1111_p9 = pneg %p1651_p6 }
  0x8c   : > { %s821_s14 = sshll.u32 %s267_s23, 7 }
  0x8d   : > { %s1668_s27 = scalar_lea.hbm %s1923_s3, %s821_s14 }
  0x8e   : > { %s1109_s30 = scalar_lea.hbm %s1668_s27, 128  ;;  %p1115_p4 = scmp.lt.u32.totalorder %s1668_s27, %s1923_s3 }
  0x8f   : > { %p1110_p1 = scmp.ne.s32.totalorder %s1668_s27, %s1109_s30  ;;  %p1116_p2 = scmp.lt.u32.totalorder %s1114_s29, %s1109_s30 }
  0x90   : > { %p1118_p8 = scmp.lt.u32.totalorder %s1109_s30, %s1668_s27 }
  0x91   : > { %p1112_p10 = pnand %p1111_p9, %p1110_p1  ;;  %p1117_p11 = por %p1116_p2, %p1115_p4 }
  0x93   : > { %p1113_p12 = pneg %p1112_p10  ;;  %p1119_p3 = por %p1118_p8, %p1117_p11 }
  0x95   : > { %p1120_p7 = pnand %p1119_p3, %p1113_p12 }
  0x97   : > { %1123 = shalt.err (!%p1120_p7)
}
  0x98   : > { %s1124_s26 = scalar_lea.vmem %s1655_s5, 128  ;;  %s1324_s14 = smov [#allocation9]  }
  0x99   : > { %p1125_p1 = scmp.ne.s32.totalorder %s1655_s5, %s1124_s26  ;;  %s1129_s17 = sshll.u32 %s1324_s14, 4  ;;  %s1130_s17 = int_to_ptr.vmem [resolvable:$false] %s1129_s17 }
  0x9a   : > { %s1131_s4 = scalar_lea.vmem %s1130_s17, 256  ;;  %p1132_p5 = scmp.lt.s32.totalorder %s1655_s5, %s1130_s17 }
  0x9b   : > { %p1127_p10 = pnand %p1125_p1, %p1111_p9  ;;  %p1133_p4 = scmp.lt.s32.totalorder %s1131_s4, %s1124_s26 }
  0x9d   : > { %p1128_p13 = pneg %p1127_p10  ;;  %p1134_p2 = por %p1133_p4, %p1132_p5 }
  0x9f   : > { %p1135_p11 = pnand %p1134_p2, %p1128_p13 }
  0xa1   : > { %1138 = shalt.err (!%p1135_p11)
}
  0xa2   : > { %921 = dma.hbm_to_vmem [thread:$0]  (!%p1651_p6), %s1668_s27, 128, %s1655_s5, %s1510_s13  }
  0xa3   : > { %p150_p5 = scmp.ne.s32.totalorder %s1275_s8, %s1271_s7  ;;  %s137_s24 = sadd.s32 1, %s1279_s9 }
  0xa4   : > { %p1976_p13 = scmp.eq.s32.totalorder %s1319_s18, 0  ;;  %p1977_p9 = scmp.ne.s32.totalorder %s1279_s9, %s1275_s8 }
  0xa5   : > { %s134_s30 = ssub.s32 %s1661_s12, %s1663_s2  ;;  %p1978_p8 = scmp.eq.s32.totalorder %s1441_s19, 0 }
  0xa6   : > { %p146_p12 = por %p1977_p9, %p1976_p13  ;;  %p135_p7 = scmp.eq.s32.totalorder %s134_s30, 0 }
  0xa7   : > { %p1710_p3 = por %p150_p5, %p1978_p8  ;;  %s281_s6 = sand.u32 1, %s1279_s9  }
  0xa8   : > { %p1980_p1 = scmp.lt.s32.totalorder %s1319_s18, 2  ;;  %s822_s7 = sshll.u32 %s281_s6, 3 }
  0xa9   : > { %s1979_s21 = scalar_select %p1710_p3, 1, 0 }
  0xaa   : > { %p1717_p10 = pnand %p1980_p1, %p146_p12  ;;  %s2028_s22 = smov (!%p146_p12, %s129_s22), 0 }
  0xab   : > { %s1722_s13 = scalar_select %p135_p7, %s1279_s9, %s137_s24  }
  0xac   : > { %s895_s5 = scalar_select %p146_p12, [#allocation3], [#allocation16] }
  0xad   : > { %p1982_p6 = pmov %p1980_p1  ;;  %p1983_p4 = pmov %p1980_p1 }
  0xae   : > { %s285_s2 = scalar_lea.vmem [#allocation10], %s822_s7  ;;  %s1984_s14 = sld [smem:[#allocation35_spill]] }
  0xaf   : > { %s2030_s5 = smov (!%p1982_p6, %s895_s5), [#allocation20]  ;;  %s2032_s22 = smov (!%p1983_p4, %s2028_s22), 0 }
  0xb0   : > { %s288_s12 = sld [smem:[%s2030_s5 + %s2032_s22]]  ;;  %s295_s27 = sshll.u32 %s285_s2, 4  ;;  %s1730_s27 = int_to_ptr.vmem [resolvable:$true] %s295_s27 }
  0xb1   : > { %s282_s20 = scalar_lea.sflag [#allocation11], %s281_s6  ;;  %p1141_p11 = pneg %p1717_p10 }
  0xb4   : > { %s1985_s4 = smov %s1984_s14 }
  0xb5   : > { %s1144_s7 = scalar_lea.hbm %s1985_s4, 2048 }
  0xb6   : > { %s824_s28 = sshll.u32 %s288_s12, 7 }
  0xb7   : > { %s1735_s17 = scalar_lea.hbm %s1984_s14, %s824_s28 }
  0xb8   : > { %s1139_s24 = scalar_lea.hbm %s1735_s17, 128  ;;  %p1145_p9 = scmp.lt.u32.totalorder %s1735_s17, %s1985_s4 }
  0xb9   : > { %p1140_p2 = scmp.ne.s32.totalorder %s1735_s17, %s1139_s24  ;;  %p1146_p12 = scmp.lt.u32.totalorder %s1144_s7, %s1139_s24 }
  0xba   : > { %p1148_p7 = scmp.lt.u32.totalorder %s1139_s24, %s1735_s17 }
  0xbb   : > { %p1142_p5 = pnand %p1141_p11, %p1140_p2  ;;  %p1147_p8 = por %p1146_p12, %p1145_p9 }
  0xbd   : > { %p1143_p13 = pneg %p1142_p5  ;;  %p1149_p1 = por %p1148_p7, %p1147_p8 }
  0xbf   : > { %p1150_p6 = pnand %p1149_p1, %p1143_p13 }
  0xc1   : > { %1153 = shalt.err (!%p1150_p6)
}
  0xc2   : > { %s1154_s6 = scalar_lea.vmem %s1730_s27, 128  ;;  %s1325_s2 = smov [#allocation10]  }
  0xc3   : > { %p1155_p4 = scmp.ne.s32.totalorder %s1730_s27, %s1154_s6  ;;  %s1159_s28 = sshll.u32 %s1325_s2, 4  ;;  %s1160_s28 = int_to_ptr.vmem [resolvable:$false] %s1159_s28 }
  0xc4   : > { %s1161_s23 = scalar_lea.vmem %s1160_s28, 256  ;;  %p1162_p3 = scmp.lt.s32.totalorder %s1730_s27, %s1160_s28 }
  0xc5   : > { %p1157_p2 = pnand %p1155_p4, %p1141_p11  ;;  %p1163_p9 = scmp.lt.s32.totalorder %s1161_s23, %s1154_s6 }
  0xc7   : > { %p1158_p5 = pneg %p1157_p2  ;;  %p1164_p12 = por %p1163_p9, %p1162_p3 }
  0xc9   : > { %p1165_p8 = pnand %p1164_p12, %p1158_p5 }
  0xcb   : > { %1168 = shalt.err (!%p1165_p8)
}
  0xcc   : > { %926 = dma.hbm_to_vmem [thread:$0]  (!%p1717_p10), %s1735_s17, 128, %s1730_s27, %s282_s20  }
  0xcd   : > { %304 = sbr.rel (%p1495_p0) target bundleno = 282 (0x11a), region = 40  ;;  %s1986_s26 = sld [smem:[#allocation32_spill]] (!%p1495_p0) }
  0xce   : > { %s306_s14 = sand.u32 (!%p1495_p0), 1, %s1311_s16  }
  0xcf   : > { %s1765_s24 = sshll.u32 (!%p1495_p0), %s306_s14, 3  ;;  %s307_s22 = scalar_lea.sflag (!%p1495_p0), [#allocation5], %s306_s14 }
  0xd0   : > { %s310_s30 = scalar_lea.vmem (!%p1495_p0), [#allocation4], %s1765_s24 }
  0xd3   : > { %p1987_p11 = scmp.ne.s32.totalorder (!%p1495_p0), %s1986_s26, 0 }
  0xd5   : > { %1250 = dma.done.wait (%p1987_p11), %s307_s22, 128  }
  0xd6   : > { %1252 = vsyncadd (%p1987_p11), %s307_s22, 4294967168  ;;  %s1988_s29 = sld [smem:[#allocation27_spill]]  ;;  %s1989_s7 = sld [smem:[#allocation30_spill]] }
  0xd7   : > { %s315_s27 = sand.u32 1, %s1441_s19  }
  0xd8   : > { %s316_s20 = scalar_lea.sflag [#allocation8], %s315_s27 }
  0xdc   : > { %s317_s17 = sand.u32 1, %s1988_s29   ;;  %p1990_p0 = scmp.ne.s32.totalorder %s1989_s7, 0 }
  0xdd   : > { %s827_s25 = sshll.u32 %s317_s17, 3 }
  0xde   : > { %s319_s5 = scalar_lea.vmem [#allocation7], %s827_s25 }
  0xdf   : > { %1254 = dma.done.wait (%p1990_p0), %s316_s20, 128  }
  0xe0   : > { %1256 = vsyncadd (%p1990_p0), %s316_s20, 4294967168  ;;  %s326_s12 = sand.u32 1, %s1287_s11   ;;  %p1991_p3 = scmp.ne.s32.totalorder %s1971_s15, 0 }
  0xe1   : > { %s828_s6 = sshll.u32 %s326_s12, 3 }
  0xe2   : > { %s328_s2 = scalar_lea.vmem [#allocation9], %s828_s6 }
  0xe3   : > { %1258 = dma.done.wait (%p1991_p3), %s316_s20, 128  }
  0xe4   : > { %1260 = vsyncadd (%p1991_p3), %s316_s20, 4294967168  ;;  %s333_s28 = sand.u32 1, %s1275_s8   ;;  %p1992_p10 = scmp.ne.s32.totalorder %s1979_s21, 0 }
  0xe5   : > { %s829_s23 = sshll.u32 %s333_s28, 3  ;;  %s334_s26 = scalar_lea.sflag [#allocation11], %s333_s28 }
  0xe6   : > { %s337_s14 = scalar_lea.vmem [#allocation10], %s829_s23 }
  0xe7   : > { %1262 = dma.done.wait (%p1992_p10), %s334_s26, 128  }
  0xe8   : > { %1264 = vsyncadd (%p1992_p10), %s334_s26, 4294967168  ;;  %v393_v0 = vlaneseq  ;;  %v1326_v1 = vmov 1966171168   ;;  %s830_s15 = sshll.u32 %s1441_s19, 2  ;;  %s1993_s29 = sld [smem:[#allocation36_spill]]  ;;  %v386_v7 = vld [vmem:[%s310_s30] sm:$0xff] }
  0xe9   : > { %v391_v2 = vunpack.c.l.s4 %v1326_v1  ;;  %v456_v8 = vld [vmem:[%s319_s5] sm:$0xff]  ;;  %v526_v11 = vld [vmem:[%s328_s2] sm:$0xff]  ;;  %s1798_s21 = scalar_lea.vmem [#allocation12], %s830_s15  ;;  %s1327_s30 = smov [#allocation12]  }
  0xea   : > { %v394_v3 = vshrl.u32 %v393_v0, 7  ;;  %v596_v12 = vld [vmem:[%s337_s14] sm:$0xff]  ;;  %s672_s7 = sshll.u32 %s1327_s30, 4  ;;  %p928_p13 = scmp.eq.s32.totalorder %s1441_s19, 1  ;;  %s673_s7 = int_to_ptr.vmem [resolvable:$true] %s672_s7 }
  0xeb   : > { %v392_v4 = vunpack.c.0.s8 %v391_v2  ;;  %s1169_s27 = scalar_lea.vmem %s673_s7, 1024  ;;  %p1176_p4 = scmp.lt.s32.totalorder %s673_s7, %s673_s7 }
  0xec   : > { %p1170_p7 = scmp.ne.s32.totalorder %s673_s7, %s1169_s27  ;;  %p1177_p2 = scmp.lt.s32.totalorder %s1169_s27, %s1169_s27 }
  0xed   : > { %v1788_v5 = vsub.s32 %v392_v4, %v394_v3 }
  0xee   : > { %v385_v6 = vld [vmem:[%s1993_s29] sm:$0xff]  ;;  %p1171_p1 = pnand %p1170_p7, %p928_p13  ;;  %p1178_p5 = por %p1177_p2, %p1176_p4 }
  0xef   : > { %v387_v9 = vadd.f32 %v386_v7, %v385_v6  ;;  %v457_v10 = vadd.f32 %v456_v8, %v385_v6  ;;  %v527_v13 = vadd.f32 %v526_v11, %v385_v6  ;;  %v597_v14 = vadd.f32 %v596_v12, %v385_v6 }
  0xf0   : > { %p1172_p6 = pneg %p1171_p1 }
  0xf1   : > { %v396_v15 = vrot.slane %v387_v9, %v1788_v5  ;;  %v389_v16 = vcombine.high %v387_v9, %v387_v9  ;;  %v466_v17 = vrot.slane %v457_v10, %v1788_v5  ;;  %v459_v18 = vcombine.high %v457_v10, %v457_v10 }
  0xf2   : > { %v536_v19 = vrot.slane %v527_v13, %v1788_v5  ;;  %v529_v20 = vcombine.high %v527_v13, %v527_v13  ;;  %v606_v21 = vrot.slane %v597_v14, %v1788_v5  ;;  %v599_v22 = vcombine.high %v597_v14, %v597_v14  ;;  %p1179_p9 = pnand %p1178_p5, %p1172_p6 }
  0xf3   : > { %831 = vst.sshfl [vmem:[%s1798_s21] sm:$0x1 pattern:$0x73625140] %v396_v15  ;;  %v404_v23 = vcombine.high %v396_v15, %v396_v15  ;;  %v412_v24 = vrot.slane %v396_v15, %v1788_v5  ;;  %v403_v25 = vrot.slane %v389_v16, %v1788_v5  ;;  %v474_v26 = vcombine.high %v466_v17, %v466_v17 }
  0xf4   : > { %874 = vst.sshfl [vmem:[%s1798_s21 + $0x1] sm:$0x1 pattern:$0x73625140] %v466_v17  ;;  %v482_v27 = vrot.slane %v466_v17, %v1788_v5  ;;  %v473_v28 = vrot.slane %v459_v18, %v1788_v5  ;;  %v544_v29 = vcombine.high %v536_v19, %v536_v19  ;;  %v552_v30 = vrot.slane %v536_v19, %v1788_v5 }
  0xf5   : > { %878 = vst.sshfl [vmem:[%s1798_s21 + $0x2] sm:$0x1 pattern:$0x73625140] %v536_v19  ;;  %v434_v31 = vcombine.high %v412_v24, %v412_v24  ;;  %v426_v32 = vrot.slane %v404_v23, %v1788_v5  ;;  %v405_v33 = vcombine.high %v403_v25, %v403_v25  ;;  %v419_v34 = vrot.slane %v403_v25, %v1788_v5 }
  0xf6   : > { %882 = vst.sshfl [vmem:[%s1798_s21 + $0x3] sm:$0x1 pattern:$0x73625140] %v606_v21  ;;  %v504_v35 = vcombine.high %v482_v27, %v482_v27  ;;  %v496_v36 = vrot.slane %v474_v26, %v1788_v5  ;;  %v475_v37 = vcombine.high %v473_v28, %v473_v28  ;;  %v489_v38 = vrot.slane %v473_v28, %v1788_v5 }
  0xf7   : > { %832 = vst.sshfl [vmem:[%s1798_s21 + $0x8] sm:$0x1 pattern:$0x73625140] %v404_v23  ;;  %450 = vst [vmem:[%s1798_s21 + $0x10] sm:$0x1] %v434_v31  ;;  %v436_v39 = vcombine.high %v426_v32, %v426_v32  ;;  %v435_v40 = vcombine.high %v419_v34, %v419_v34  ;;  %v433_v41 = vrot.slane %v405_v33, %v1788_v5 }
  0xf8   : > { %833 = vst.sshfl [vmem:[%s1798_s21 + $0x20] sm:$0x1 pattern:$0x73625140] %v403_v25  ;;  %v574_v42 = vcombine.high %v552_v30, %v552_v30  ;;  %838 = vst [vmem:[%s1798_s21 + $0x11] sm:$0x1] %v504_v35  ;;  %v506_v43 = vcombine.high %v496_v36, %v496_v36  ;;  %v505_v44 = vcombine.high %v489_v38, %v489_v38 }
  0xf9   : > { %875 = vst.sshfl [vmem:[%s1798_s21 + $0x9] sm:$0x1 pattern:$0x73625140] %v474_v26  ;;  %v503_v45 = vrot.slane %v475_v37, %v1788_v5  ;;  %v566_v46 = vrot.slane %v544_v29, %v1788_v5  ;;  %451 = vst [vmem:[%s1798_s21 + $0x18] sm:$0x1] %v436_v39  ;;  %v437_v47 = vcombine.high %v433_v41, %v433_v41 }
  0xfa   : > { %876 = vst.sshfl [vmem:[%s1798_s21 + $0x21] sm:$0x1 pattern:$0x73625140] %v473_v28  ;;  %454 = vst [vmem:[%s1798_s21 + $0x30] sm:$0x1] %v435_v40  ;;  %v543_v48 = vrot.slane %v529_v20, %v1788_v5  ;;  %v614_v49 = vcombine.high %v606_v21, %v606_v21  ;;  %v622_v50 = vrot.slane %v606_v21, %v1788_v5 }
  0xfb   : > { %879 = vst.sshfl [vmem:[%s1798_s21 + $0xa] sm:$0x1 pattern:$0x73625140] %v544_v29  ;;  %847 = vst [vmem:[%s1798_s21 + $0x12] sm:$0x1] %v574_v42  ;;  %v507_v51 = vcombine.high %v503_v45, %v503_v45  ;;  %v576_v52 = vcombine.high %v566_v46, %v566_v46  ;;  %v613_v53 = vrot.slane %v599_v22, %v1788_v5 }
  0xfc   : > { %834 = vst.sshfl [vmem:[%s1798_s21 + $0x28] sm:$0x1 pattern:$0x73625140] %v405_v33  ;;  %839 = vst [vmem:[%s1798_s21 + $0x19] sm:$0x1] %v506_v43  ;;  %v545_v54 = vcombine.high %v543_v48, %v543_v48  ;;  %v559_v55 = vrot.slane %v543_v48, %v1788_v5  ;;  %v644_v56 = vcombine.high %v622_v50, %v622_v50 }
  0xfd   : > { %877 = vst.sshfl [vmem:[%s1798_s21 + $0x29] sm:$0x1 pattern:$0x73625140] %v475_v37  ;;  %842 = vst [vmem:[%s1798_s21 + $0x31] sm:$0x1] %v505_v44  ;;  %v636_v57 = vrot.slane %v614_v49, %v1788_v5  ;;  %v615_v58 = vcombine.high %v613_v53, %v613_v53  ;;  %v629_v59 = vrot.slane %v613_v53, %v1788_v5 }
  0xfe   : > { %455 = vst [vmem:[%s1798_s21 + $0x38] sm:$0x1] %v437_v47  ;;  %880 = vst.sshfl [vmem:[%s1798_s21 + $0x22] sm:$0x1 pattern:$0x73625140] %v543_v48  ;;  %v575_v60 = vcombine.high %v559_v55, %v559_v55  ;;  %v573_v61 = vrot.slane %v545_v54, %v1788_v5 }
  0xff   : > { %883 = vst.sshfl [vmem:[%s1798_s21 + $0xb] sm:$0x1 pattern:$0x73625140] %v614_v49  ;;  %843 = vst [vmem:[%s1798_s21 + $0x39] sm:$0x1] %v507_v51  ;;  %v646_v62 = vcombine.high %v636_v57, %v636_v57  ;;  %v645_v63 = vcombine.high %v629_v59, %v629_v59  ;;  %v643_v0 = vrot.slane %v615_v58, %v1788_v5 }
 0x100   : > { %848 = vst [vmem:[%s1798_s21 + $0x1a] sm:$0x1] %v576_v52  ;;  %884 = vst.sshfl [vmem:[%s1798_s21 + $0x23] sm:$0x1 pattern:$0x73625140] %v613_v53  ;;  %v577_v1 = vcombine.high %v573_v61, %v573_v61 }
 0x101   : > { %881 = vst.sshfl [vmem:[%s1798_s21 + $0x2a] sm:$0x1 pattern:$0x73625140] %v545_v54  ;;  %856 = vst [vmem:[%s1798_s21 + $0x13] sm:$0x1] %v644_v56  ;;  %v647_v2 = vcombine.high %v643_v0, %v643_v0 }
 0x102   : > { %885 = vst.sshfl [vmem:[%s1798_s21 + $0x2b] sm:$0x1 pattern:$0x73625140] %v615_v58  ;;  %851 = vst [vmem:[%s1798_s21 + $0x32] sm:$0x1] %v575_v60 }
 0x103   : > { %857 = vst [vmem:[%s1798_s21 + $0x1b] sm:$0x1] %v646_v62  ;;  %860 = vst [vmem:[%s1798_s21 + $0x33] sm:$0x1] %v645_v63 }
 0x104   : > { %852 = vst [vmem:[%s1798_s21 + $0x3a] sm:$0x1] %v577_v1  ;;  %861 = vst [vmem:[%s1798_s21 + $0x3b] sm:$0x1] %v647_v2 }
 0x105   : > { %1182 = shalt.err (!%p1179_p9)
}
 0x106   : > { %s1994_s20 = sld [smem:[#allocation37_spill]] }
 0x10c   : > { %s1183_s5 = scalar_lea.hbm %s1994_s20, 1024 }
 0x10d   : > { %p1184_p12 = scmp.ne.s32.totalorder %s1994_s20, %s1183_s5  ;;  %p1189_p0 = scmp.lt.u32.totalorder %s1183_s5, %s1994_s20 }
 0x10f   : > { %p1185_p8 = pnand %p1184_p12, %p928_p13 }
 0x111   : > { %p1186_p11 = pneg %p1185_p8 }
 0x113   : > { %p1191_p3 = pnand %p1189_p0, %p1186_p11 }
 0x115   : > { %1194 = shalt.err (!%p1191_p3)
}
 0x116   : > { %s1328_s23 = smov 128   ;;  %s1329_s26 = smov 8  }
 0x117   : > { %903 = dma.vmem_to_hbm [thread:$0]  (%p928_p13), %s673_s7, 1024, %s1994_s20, [#allocation6], %s1328_s23, %s1328_s23, %s1329_s26  }
 0x118   : > { %1266 = dma.done.wait (%p928_p13), [#allocation6], 1024  }
 0x119   : > { %1268 = vsyncadd (%p928_p13), [#allocation6], 4294966272 }
 0x11a PF: > { %s30_s18 = sadd.s32 1, %s1319_s18   ;;  %s1996_s22 = smov %s1637_s10 }
 0x11b   : > { %p1876_p10 = scmp.ge.s32.totalorder %s30_s18, 4   ;;  %s1997_s12 = sld [smem:[#allocation27_spill]] }
 0x11c   : > { %s1998_s29 = sld [smem:[#allocation28_spill]]  ;;  %s1999_s14 = sld [smem:[#allocation31_spill]] }
 0x11d   : > { %s2000_s21 = sld [smem:[#allocation29_spill]]  ;;  %s2001_s17 = sld [smem:[#allocation33_spill]] }
 0x11e   : > { %s2002_s7 = smov %s1275_s8  ;;  %s2003_s8 = smov %s1279_s9 }
 0x11f   : > { %s2004_s9 = smov %s1722_s13  ;;  %s2005_s10 = smov %s1287_s11 }
 0x120   : > { %s2006_s11 = smov %s1291_s0  ;;  %s2007_s0 = smov %s1996_s22 }
 0x121   : > { %s2009_s15 = smov %s1311_s16  ;;  %29 = sbr.rel (!%p1876_p10) target bundleno = 26 (0x1a), region = 118 }
 0x122   : > { %s2008_s13 = smov %s1998_s29 }
 0x123   : > { %s2010_s16 = smov %s2000_s21 }
 0x128   :  { %688 = vsyncpa [#allocation5], 1 }
 0x129   :  { %690 = vsyncpa [#allocation5 + $0x1], 1 }
 0x12a   :  { %691 = vsyncpa [#allocation8], 1 }
 0x12b   :  { %693 = vsyncpa [#allocation8 + $0x1], 1 }
 0x12c   :  { %694 = vsyncpa [#allocation11], 1 }
 0x12d   :  { %696 = vsyncpa [#allocation11 + $0x1], 1 }
 0x12e   :  { %697 = vsyncpa [#allocation6], 1 }
 0x12f   :  { %699 = vsyncpa [#allocation6 + $0x1], 1 }

</bundles_post_ra>
